<compile_context>
chip_gen: v7x
topology: tpu7x:2x2x1
jax: 0.10.0
libtpu: 0.0.40
codegen_flags: <defaults>
</compile_context>

<pallas_src>
import jax
import jax.numpy as jnp
from jax import lax
from jax.experimental import pallas as pl
from jax.experimental.pallas import tpu as pltpu

LANE = 128
SUBLANE = 8
N_STATS = 6  # sum_x, sum_y, sum_xx, sum_yy, sum_xy, sum_(x-y)^2


def _cdiv(a, b):
    return -(-a // b)


def _round_up(a, b):
    return _cdiv(a, b) * b


def _make_kernel(tm, slab, rows, tiles_per_core, unroll, needs_mask):
    """Builds the partial-sums kernel (all sizes are Python ints, closed over)."""
    n_slabs = tm // slab
    unroll = max(1, min(unroll, n_slabs))

    def kernel(x_ref, y_ref, acc_ref):
        i = pl.program_id(1)

        # Zero this core's resident accumulator block at the first reduction step.
        @pl.when(i == 0)
        def _():
            acc_ref[...] = jnp.zeros_like(acc_ref)

        zeros = jnp.zeros((slab, LANE), jnp.float32)
        init = (zeros,) * N_STATS

        def stats(xs, ys, carry):
            ax, ay, axx, ayy, axy, add = carry
            d = xs - ys
            return (ax + xs, ay + ys, axx + xs * xs, ayy + ys * ys,
                    axy + xs * ys, add + d * d)

        def run(masked, rem):
            def body(k, carry):
                base = pl.multiple_of(k * slab, slab)
                xs = x_ref[pl.ds(base, slab), :].astype(jnp.float32)
                ys = y_ref[pl.ds(base, slab), :].astype(jnp.float32)
                if masked:
                    ridx = base + lax.broadcasted_iota(jnp.int32, (slab, LANE), 0)
                    keep = ridx < rem
                    xs = jnp.where(keep, xs, 0.0)
                    ys = jnp.where(keep, ys, 0.0)
                return stats(xs, ys, carry)

            return lax.fori_loop(0, n_slabs, body, init,
                                 unroll=(1 if masked else unroll))

        def accumulate(sums):
            for j, p in enumerate(sums):
                acc_ref[j * slab:(j + 1) * slab, :] += p

        if not needs_mask:
            # Grid exactly covers the rows: hot path only.
            accumulate(run(False, None))
        else:
            c = pl.program_id(0)
            row0 = (c * tiles_per_core + i) * tm      # logical first row of this tile
            rem = rows - row0                          # valid rows in this tile

            @pl.when(rem >= tm)
            def _():                                   # full tile: unmasked, unrolled
                accumulate(run(False, None))

            @pl.when(rem < tm)
            def _():                                   # partial / empty tile: masked
                accumulate(run(True, rem))

    return kernel


def _partial_sums_pallas(x2, y2, rows, *, tm, num_cores, core_parallel,
                         unroll, buffers):
    """Returns the six global sums over the (rows, 128) slabs x2/y2."""
    itemsize_x = jnp.dtype(x2.dtype).itemsize
    itemsize_y = jnp.dtype(y2.dtype).itemsize
    slab = 16 if (itemsize_x == 2 and itemsize_y == 2) else SUBLANE
    if slab == 16:
        unroll = min(unroll, 4)   # keep 2*unroll upcast slabs + 6 accums in 64 vregs

    nc = max(1, int(num_cores))
    rows_per_core = _cdiv(rows, nc)
    tm_eff = max(slab, min(_round_up(int(tm), slab), _round_up(rows_per_core, slab)))
    tiles_per_core = _cdiv(rows_per_core, tm_eff)
    needs_mask = (nc * tiles_per_core * tm_eff != rows)

    # Clamp block indices so every DMA starts in-bounds even if a trailing tile
    # is logically empty (the in-kernel mask zeroes its contribution).
    last_block = _cdiv(rows, tm_eff) - 1
    in_map = lambda c, i: (jnp.minimum(c * tiles_per_core + i, last_block), 0)
    out_map = lambda c, i: (c, 0)

    kernel = _make_kernel(tm_eff, slab, rows, tiles_per_core, unroll, needs_mask)

    block_kwargs = {}
    if buffers != 2:
        block_kwargs = dict(pipeline_mode=pl.Buffered(int(buffers)))  # e.g. 3 on v7x
    in_spec_x = pl.BlockSpec((tm_eff, LANE), in_map, **block_kwargs)
    in_spec_y = pl.BlockSpec((tm_eff, LANE), in_map, **block_kwargs)

    lead_sem = pltpu.CORE_PARALLEL if (nc > 1 and core_parallel) else pltpu.PARALLEL

    in_block_bytes = tm_eff * LANE * (itemsize_x + itemsize_y)
    vmem_limit = int(max(16 << 20, max(2, int(buffers)) * in_block_bytes + (8 << 20)))

    acc = pl.pallas_call(
        kernel,
        out_shape=jax.ShapeDtypeStruct((nc * N_STATS * slab, LANE), jnp.float32),
        grid_spec=pltpu.PrefetchScalarGridSpec(
            num_scalar_prefetch=0,
            grid=(nc, tiles_per_core),
            in_specs=[in_spec_x, in_spec_y],
            out_specs=pl.BlockSpec((N_STATS * slab, LANE), out_map),
        ),
        compiler_params=pltpu.CompilerParams(
            dimension_semantics=(lead_sem, pltpu.ARBITRARY),
            vmem_limit_bytes=vmem_limit),
    )(x2, y2)

    # Tiny cross-core / cross-lane combine in plain JAX -> (6,) f32
    return acc.reshape(nc, N_STATS, slab, LANE).sum(axis=(0, 2, 3))


def total_loss(logits, targets, loss_param, *, tm=4096, num_cores=1,
               core_parallel=True, unroll=8, buffers=2):
    """Pallas implementation of TotalLoss.forward. Returns a scalar f32.

    num_cores=1 for single-TensorCore chips (v5e/v6e); num_cores=2 on v7x
    (uses CORE_PARALLEL for the leading grid axis when core_parallel=True).
    """
    assert logits.shape == targets.shape
    n_elems = int(logits.size)
    assert n_elems >= 2, "need at least 2 elements (unbiased variance)"

    flat_x = logits.reshape(-1)
    flat_y = targets.reshape(-1)

    rows = n_elems // LANE          # full 128-lane rows -> streamed by the kernel
    n_main = rows * LANE
    n_tail = n_elems - n_main       # < 128 trailing elements -> plain JAX below

    if rows > 0:
        if n_tail == 0:
            x2 = flat_x.reshape(rows, LANE)   # free, row-major bitcast
            y2 = flat_y.reshape(rows, LANE)
        else:
            # TODO(synk): for element counts not divisible by 128 this prefix slice
            # still materializes one copy of each input; a 1-D-block kernel would
            # avoid it but needs element-granular masking.
            x2 = flat_x[:n_main].reshape(rows, LANE)
            y2 = flat_y[:n_main].reshape(rows, LANE)
        sums = _partial_sums_pallas(
            x2, y2, rows, tm=tm, num_cores=num_cores,
            core_parallel=core_parallel, unroll=unroll, buffers=buffers)
        sum_x, sum_y, sum_xx, sum_yy, sum_xy, sum_dd = (sums[k] for k in range(N_STATS))
    else:
        sum_x = sum_y = sum_xx = sum_yy = sum_xy = sum_dd = jnp.float32(0.0)

    if n_tail > 0:
        tx = flat_x[n_main:].astype(jnp.float32)
        ty = flat_y[n_main:].astype(jnp.float32)
        sum_x = sum_x + tx.sum()
        sum_y = sum_y + ty.sum()
        sum_xx = sum_xx + (tx * tx).sum()
        sum_yy = sum_yy + (ty * ty).sum()
        sum_xy = sum_xy + (tx * ty).sum()
        sum_dd = sum_dd + ((tx - ty) ** 2).sum()

    n = jnp.float32(n_elems)
    mean_x = sum_x / n   # pred mean
    mean_y = sum_y / n   # true mean

    total = jnp.float32(0.0)
    if 'MSE' in loss_param:
        total = total + jnp.float32(loss_param['MSE']['w']) * (sum_dd / n)
    if 'CCC' in loss_param:
        cov = sum_xy / n - mean_x * mean_y                    # biased (torch.mean)
        var_x = (sum_xx - n * mean_x * mean_x) / (n - 1.0)    # unbiased (torch.var)
        var_y = (sum_yy - n * mean_y * mean_y) / (n - 1.0)
        ccc_loss = 1.0 - 2.0 * cov / (var_y + var_x + (mean_y - mean_x) ** 2)
        total = total + jnp.float32(loss_param['CCC']['w']) * ccc_loss
    return total


def total_loss_ref(logits, targets, loss_param):
    """Pure-JAX reference mirroring the PyTorch forward."""
    x = logits.astype(jnp.float32)
    y = targets.astype(jnp.float32)
    total = jnp.float32(0.0)
    if 'MSE' in loss_param:
        total += loss_param['MSE']['w'] * jnp.mean((x - y) ** 2)
    if 'CCC' in loss_param:
        mean_true = y.mean()
        mean_pred = x.mean()
        cov = jnp.mean((x - mean_pred) * (y - mean_true))
        var_true = jnp.var(y, ddof=1)   # torch.var default: unbiased
        var_pred = jnp.var(x, ddof=1)
        total += loss_param['CCC']['w'] * (
            1.0 - 2.0 * cov / (var_true + var_pred + (mean_true - mean_pred) ** 2))
    return total


if __name__ == "__main__":
    # TotalLoss has no learnable parameters; loss_param drives the forward.
    loss_param = {'MSE': {'w': 1.0}, 'CCC': {'w': 0.5}}

    key = jax.random.PRNGKey(0)
    k1, k2 = jax.random.split(key)

    def check(shape, dtype=jnp.float32, rtol=1e-4, atol=1e-5, **kw):
        x = jax.random.normal(k1, shape, dtype=jnp.float32).astype(dtype)
        y = jax.random.normal(k2, shape, dtype=jnp.float32).astype(dtype)
        out = jax.block_until_ready(total_loss(x, y, loss_param, **kw))
        ref = jax.block_until_ready(total_loss_ref(x, y, loss_param))
        assert jnp.allclose(out, ref, rtol=rtol, atol=atol), (shape, dtype, out, ref)

    # 1) 128-aligned NCHW input, single tile, zero-copy path.
    check((2, 4, 16, 16))
    # 2) fully non-aligned shape: masked last tile + <128-element tail path.
    check((3, 5, 7, 11))
    # 3) multiple grid steps with a masked trailing tile (accumulator revisit).
    check((2, 4, 30, 32), tm=16)
    # 4) bf16 streaming path (16-row slabs, f32 accumulation).
    check((2, 4, 16, 16), dtype=jnp.bfloat16, rtol=2e-3, atol=1e-3)

    print("KERNEL_OK")
</pallas_src>

<mosaic_0001>
module attributes {stable_mosaic.version = 11 : i64} {
  func.func @kernel(%arg0: i32, %arg1: i32, %arg2: memref<16x128xf32, #tpu.memory_space<vmem>>, %arg3: memref<16x128xf32, #tpu.memory_space<vmem>>, %arg4: memref<48x128xf32, #tpu.memory_space<vmem>>) attributes {dimension_semantics = [#tpu.dimension_semantics<parallel>, #tpu.dimension_semantics<arbitrary>], iteration_bounds = array<i64: 1, 1>, scalar_prefetch = 0 : i64, scratch_operands = 0 : i64, tpu.core_type = #tpu.core_type<tc>, window_params = [{transform_indices = @transform_0, window_bounds = array<i64: 16, 128>}, {transform_indices = @transform_1, window_bounds = array<i64: 16, 128>}, {transform_indices = @transform_2, window_bounds = array<i64: 48, 128>}]} {
    %c0_i32 = arith.constant 0 : i32
    %0 = arith.cmpi eq, %arg1, %c0_i32 : i32
    %1 = arith.extui %0 : i1 to i32
    %c0_i32_0 = arith.constant 0 : i32
    %2 = arith.cmpi ne, %1, %c0_i32_0 : i32
    scf.if %2 {
      %cst_25 = arith.constant 0.000000e+00 : f32
      %56 = vector.broadcast %cst_25 : f32 to vector<48x128xf32>
      %c0_26 = arith.constant 0 : index
      %c0_27 = arith.constant 0 : index
      %57 = vector.load %arg4[%c0_26, %c0_27] : memref<48x128xf32, #tpu.memory_space<vmem>>, vector<48x128xf32>
      tpu.vector_store %arg4[%c0_26, %c0_27], %56 {strides = array<i32>} : memref<48x128xf32, #tpu.memory_space<vmem>>, vector<48x128xf32>,
    } else {
    }
    %cst = arith.constant 0.000000e+00 : f32
    %3 = vector.broadcast %cst : f32 to vector<8x128xf32>
    %c0_i32_1 = arith.constant 0 : i32
    %c8_i32 = arith.constant 8 : i32
    %4 = arith.muli %c0_i32_1, %c8_i32 : i32
    %5 = tpu.assume_multiple %4, 8 : i32
    %6 = arith.index_cast %5 : i32 to index
    %c0 = arith.constant 0 : index
    %7 = vector.load %arg2[%6, %c0] : memref<16x128xf32, #tpu.memory_space<vmem>>, vector<8x128xf32>
    %8 = arith.index_cast %5 : i32 to index
    %c0_2 = arith.constant 0 : index
    %9 = vector.load %arg3[%8, %c0_2] : memref<16x128xf32, #tpu.memory_space<vmem>>, vector<8x128xf32>
    %10 = arith.subf %7, %9 : vector<8x128xf32>
    %11 = arith.addf %3, %7 : vector<8x128xf32>
    %12 = arith.addf %3, %9 : vector<8x128xf32>
    %13 = arith.mulf %7, %7 : vector<8x128xf32>
    %14 = arith.addf %3, %13 : vector<8x128xf32>
    %15 = arith.mulf %9, %9 : vector<8x128xf32>
    %16 = arith.addf %3, %15 : vector<8x128xf32>
    %17 = arith.mulf %7, %9 : vector<8x128xf32>
    %18 = arith.addf %3, %17 : vector<8x128xf32>
    %19 = arith.mulf %10, %10 : vector<8x128xf32>
    %20 = arith.addf %3, %19 : vector<8x128xf32>
    %c1_i32 = arith.constant 1 : i32
    %c8_i32_3 = arith.constant 8 : i32
    %21 = arith.muli %c1_i32, %c8_i32_3 : i32
    %22 = tpu.assume_multiple %21, 8 : i32
    %23 = arith.index_cast %22 : i32 to index
    %c0_4 = arith.constant 0 : index
    %24 = vector.load %arg2[%23, %c0_4] : memref<16x128xf32, #tpu.memory_space<vmem>>, vector<8x128xf32>
    %25 = arith.index_cast %22 : i32 to index
    %c0_5 = arith.constant 0 : index
    %26 = vector.load %arg3[%25, %c0_5] : memref<16x128xf32, #tpu.memory_space<vmem>>, vector<8x128xf32>
    %27 = arith.subf %24, %26 : vector<8x128xf32>
    %28 = arith.addf %11, %24 : vector<8x128xf32>
    %29 = arith.addf %12, %26 : vector<8x128xf32>
    %30 = arith.mulf %24, %24 : vector<8x128xf32>
    %31 = arith.addf %14, %30 : vector<8x128xf32>
    %32 = arith.mulf %26, %26 : vector<8x128xf32>
    %33 = arith.addf %16, %32 : vector<8x128xf32>
    %34 = arith.mulf %24, %26 : vector<8x128xf32>
    %35 = arith.addf %18, %34 : vector<8x128xf32>
    %36 = arith.mulf %27, %27 : vector<8x128xf32>
    %37 = arith.addf %20, %36 : vector<8x128xf32>
    %c2_i32 = arith.constant 2 : i32
    %c0_6 = arith.constant 0 : index
    %c0_7 = arith.constant 0 : index
    %38 = vector.load %arg4[%c0_6, %c0_7] : memref<48x128xf32, #tpu.memory_space<vmem>>, vector<8x128xf32>
    %39 = arith.addf %38, %28 : vector<8x128xf32>
    %c0_8 = arith.constant 0 : index
    %c0_9 = arith.constant 0 : index
    %40 = vector.load %arg4[%c0_8, %c0_9] : memref<48x128xf32, #tpu.memory_space<vmem>>, vector<8x128xf32>
    tpu.vector_store %arg4[%c0_8, %c0_9], %39 {strides = array<i32>} : memref<48x128xf32, #tpu.memory_space<vmem>>, vector<8x128xf32>,
    %c8 = arith.constant 8 : index
    %c0_10 = arith.constant 0 : index
    %41 = vector.load %arg4[%c8, %c0_10] : memref<48x128xf32, #tpu.memory_space<vmem>>, vector<8x128xf32>
    %42 = arith.addf %41, %29 : vector<8x128xf32>
    %c8_11 = arith.constant 8 : index
    %c0_12 = arith.constant 0 : index
    %43 = vector.load %arg4[%c8_11, %c0_12] : memref<48x128xf32, #tpu.memory_space<vmem>>, vector<8x128xf32>
    tpu.vector_store %arg4[%c8_11, %c0_12], %42 {strides = array<i32>} : memref<48x128xf32, #tpu.memory_space<vmem>>, vector<8x128xf32>,
    %c16 = arith.constant 16 : index
    %c0_13 = arith.constant 0 : index
    %44 = vector.load %arg4[%c16, %c0_13] : memref<48x128xf32, #tpu.memory_space<vmem>>, vector<8x128xf32>
    %45 = arith.addf %44, %31 : vector<8x128xf32>
    %c16_14 = arith.constant 16 : index
    %c0_15 = arith.constant 0 : index
    %46 = vector.load %arg4[%c16_14, %c0_15] : memref<48x128xf32, #tpu.memory_space<vmem>>, vector<8x128xf32>
    tpu.vector_store %arg4[%c16_14, %c0_15], %45 {strides = array<i32>} : memref<48x128xf32, #tpu.memory_space<vmem>>, vector<8x128xf32>,
    %c24 = arith.constant 24 : index
    %c0_16 = arith.constant 0 : index
    %47 = vector.load %arg4[%c24, %c0_16] : memref<48x128xf32, #tpu.memory_space<vmem>>, vector<8x128xf32>
    %48 = arith.addf %47, %33 : vector<8x128xf32>
    %c24_17 = arith.constant 24 : index
    %c0_18 = arith.constant 0 : index
    %49 = vector.load %arg4[%c24_17, %c0_18] : memref<48x128xf32, #tpu.memory_space<vmem>>, vector<8x128xf32>
    tpu.vector_store %arg4[%c24_17, %c0_18], %48 {strides = array<i32>} : memref<48x128xf32, #tpu.memory_space<vmem>>, vector<8x128xf32>,
    %c32 = arith.constant 32 : index
    %c0_19 = arith.constant 0 : index
    %50 = vector.load %arg4[%c32, %c0_19] : memref<48x128xf32, #tpu.memory_space<vmem>>, vector<8x128xf32>
    %51 = arith.addf %50, %35 : vector<8x128xf32>
    %c32_20 = arith.constant 32 : index
    %c0_21 = arith.constant 0 : index
    %52 = vector.load %arg4[%c32_20, %c0_21] : memref<48x128xf32, #tpu.memory_space<vmem>>, vector<8x128xf32>
    tpu.vector_store %arg4[%c32_20, %c0_21], %51 {strides = array<i32>} : memref<48x128xf32, #tpu.memory_space<vmem>>, vector<8x128xf32>,
    %c40 = arith.constant 40 : index
    %c0_22 = arith.constant 0 : index
    %53 = vector.load %arg4[%c40, %c0_22] : memref<48x128xf32, #tpu.memory_space<vmem>>, vector<8x128xf32>
    %54 = arith.addf %53, %37 : vector<8x128xf32>
    %c40_23 = arith.constant 40 : index
    %c0_24 = arith.constant 0 : index
    %55 = vector.load %arg4[%c40_23, %c0_24] : memref<48x128xf32, #tpu.memory_space<vmem>>, vector<8x128xf32>
    tpu.vector_store %arg4[%c40_23, %c0_24], %54 {strides = array<i32>} : memref<48x128xf32, #tpu.memory_space<vmem>>, vector<8x128xf32>,
    return
  }
  func.func @transform_0(%arg0: i32, %arg1: i32) -> (i32, i32) {
    %c1_i32 = arith.constant 1 : i32
    %0 = arith.muli %arg0, %c1_i32 : i32
    %1 = arith.addi %0, %arg1 : i32
    %c0_i32 = arith.constant 0 : i32
    %2 = arith.minsi %1, %c0_i32 : i32
    %c0_i32_0 = arith.constant 0 : i32
    %c0_i32_1 = arith.constant 0 : i32
    return %2, %c0_i32_0 : i32, i32
  }
  func.func @transform_1(%arg0: i32, %arg1: i32) -> (i32, i32) {
    %c1_i32 = arith.constant 1 : i32
    %0 = arith.muli %arg0, %c1_i32 : i32
    %1 = arith.addi %0, %arg1 : i32
    %c0_i32 = arith.constant 0 : i32
    %2 = arith.minsi %1, %c0_i32 : i32
    %c0_i32_0 = arith.constant 0 : i32
    %c0_i32_1 = arith.constant 0 : i32
    return %2, %c0_i32_0 : i32, i32
  }
  func.func @transform_2(%arg0: i32, %arg1: i32) -> (i32, i32) {
    %c0_i32 = arith.constant 0 : i32
    %c0_i32_0 = arith.constant 0 : i32
    return %arg0, %c0_i32 : i32, i32
  }
}

</mosaic_0001>

<bundles_post_ra>
// kernel: tpu_custom_call.1
= control target key start
LH: loop header
LB: loop body
LE: loop exit
PB: predicated region body
PF: predicated region fallthrough
CT: control target
= control target key end

     0   :  { %7 = vsyncpa [#allocation3], 0  ;;  %s281_s0 = inlined_call_operand.hbm [shape: f32[16,128], index: 0, kind: input, shape index: {}]   ;;  %s282_s1 = inlined_call_operand.hbm [shape: f32[16,128], index: 1, kind: input, shape index: {}]   ;;  %s283_s2 = inlined_call_operand.hbm [shape: f32[48,128], index: 2, kind: output, shape index: {}]  }
   0x1   :  { %8 = vsyncpa [#allocation6], 0 }
   0x2   :  { %9 = vsyncpa [#allocation4], 0  ;;  %s216_s9 = smov [#allocation2]   ;;  %s144_s13 = scalar_lea.hbm %s281_s0, 256 }
   0x3   :  { %s21_s10 = sshll.u32 %s216_s9, 4  ;;  %p145_p0 = scmp.ne.s32.totalorder %s281_s0, %s144_s13  ;;  %s22_s10 = int_to_ptr.vmem [resolvable:$true] %s21_s10 }
   0x4   :  { %p148_p1 = scmp.lt.u32.totalorder %s144_s13, %s281_s0 }
   0x6   :  { %p150_p2 = pnand %p148_p1, %p145_p0 }
   0x8   :  { %153 = shalt.err (!%p150_p2)
}
   0x9   :  { %s154_s18 = scalar_lea.vmem %s22_s10, 256  ;;  %p159_p4 = scmp.lt.s32.totalorder %s22_s10, %s22_s10 }
   0xa   :  { %p155_p3 = scmp.ne.s32.totalorder %s22_s10, %s154_s18  ;;  %p160_p5 = scmp.lt.s32.totalorder %s154_s18, %s154_s18 }
   0xc   :  { %p161_p6 = por %p160_p5, %p159_p4 }
   0xe   :  { %p162_p7 = pnand %p161_p6, %p155_p3 }
  0x10   :  { %165 = shalt.err (!%p162_p7)
}
  0x11   :  { %s217_s19 = smov 128   ;;  %s218_s20 = smov 8  }
  0x12   :  { %27 = dma.hbm_to_vmem [thread:$0]  %s281_s0, 256, %s22_s10, [#allocation3], %s217_s19, %s217_s19, %s218_s20  }
  0x13   :  { %s219_s23 = smov [#allocation5]   ;;  %s166_s27 = scalar_lea.hbm %s282_s1, 256 }
  0x14   :  { %s39_s24 = sshll.u32 %s219_s23, 4  ;;  %p167_p8 = scmp.ne.s32.totalorder %s282_s1, %s166_s27  ;;  %s40_s24 = int_to_ptr.vmem [resolvable:$true] %s39_s24 }
  0x15   :  { %p170_p9 = scmp.lt.u32.totalorder %s166_s27, %s282_s1 }
  0x17   :  { %p172_p10 = pnand %p170_p9, %p167_p8 }
  0x19   :  { %175 = shalt.err (!%p172_p10)
}
  0x1a   :  { %s176_s4 = scalar_lea.vmem %s40_s24, 256  ;;  %p181_p12 = scmp.lt.s32.totalorder %s40_s24, %s40_s24 }
  0x1b   :  { %p177_p11 = scmp.ne.s32.totalorder %s40_s24, %s176_s4  ;;  %p182_p13 = scmp.lt.s32.totalorder %s176_s4, %s176_s4 }
  0x1d   :  { %p183_p0 = por %p182_p13, %p181_p12 }
  0x1f   :  { %p184_p1 = pnand %p183_p0, %p177_p11 }
  0x21   :  { %187 = shalt.err (!%p184_p1)
}
  0x22   :  { %45 = dma.hbm_to_vmem [thread:$0]  %s282_s1, 256, %s40_s24, [#allocation6], %s217_s19, %s217_s19, %s218_s20  }
  0x23   :  { %210 = dma.done.wait [#allocation3], 256  }
  0x24   :  { %211 = vsyncadd [#allocation3], 4294967040 }
  0x25   :  { %212 = dma.done.wait [#allocation6], 256  }
  0x26   :  { %213 = vsyncadd [#allocation6], 4294967040  ;;  %v70_v0 = vld [vmem:[#allocation2] sm:$0xff]  ;;  %v84_v1 = vld [vmem:[#allocation2 + $0x8] sm:$0xff]  ;;  %s220_s1 = smov [#allocation7]  }
  0x27   :  { %v71_v2 = vld [vmem:[#allocation5] sm:$0xff]  ;;  %v88_v3 = vadd.f32 %v84_v1, %v70_v0  ;;  %v86_v4 = vld [vmem:[#allocation5 + $0x8] sm:$0xff]  ;;  %v75_v5 = vmul.f32 %v70_v0, %v70_v0  ;;  %v90_v6 = vmul.f32 %v84_v1, %v84_v1  ;;  %s121_s6 = sshll.u32 %s220_s1, 4  ;;  %s122_s6 = int_to_ptr.vmem [resolvable:$true] %s121_s6 }
  0x28   :  { %v77_v7 = vmul.f32 %v71_v2, %v71_v2  ;;  %v89_v8 = vadd.f32 %v86_v4, %v71_v2  ;;  %v92_v9 = vmul.f32 %v86_v4, %v86_v4  ;;  %v79_v10 = vmul.f32 %v71_v2, %v70_v0  ;;  %s188_s7 = scalar_lea.vmem %s122_s6, 768  ;;  %p193_p3 = scmp.lt.s32.totalorder %s122_s6, %s122_s6 }
  0x29   :  { %v94_v11 = vmul.f32 %v86_v4, %v84_v1  ;;  %v91_v12 = vadd.f32 %v90_v6, %v75_v5  ;;  %v72_v13 = vsub.f32 %v70_v0, %v71_v2  ;;  %v87_v14 = vsub.f32 %v84_v1, %v86_v4  ;;  %100 = vst [vmem:[#allocation7] sm:$0xff] %v88_v3  ;;  %p189_p2 = scmp.ne.s32.totalorder %s122_s6, %s188_s7  ;;  %p194_p4 = scmp.lt.s32.totalorder %s188_s7, %s188_s7 }
  0x2a   :  { %v93_v15 = vadd.f32 %v92_v9, %v77_v7  ;;  %103 = vst [vmem:[#allocation7 + $0x8] sm:$0xff] %v89_v8 }
  0x2b   :  { %v95_v16 = vadd.f32 %v94_v11, %v79_v10  ;;  %v81_v17 = vmul.f32 %v72_v13, %v72_v13  ;;  %v96_v18 = vmul.f32 %v87_v14, %v87_v14  ;;  %106 = vst [vmem:[#allocation7 + $0x10] sm:$0xff] %v91_v12  ;;  %p195_p5 = por %p194_p4, %p193_p3 }
  0x2c   :  { %109 = vst [vmem:[#allocation7 + $0x18] sm:$0xff] %v93_v15 }
  0x2d   :  { %v97_v19 = vadd.f32 %v96_v18, %v81_v17  ;;  %112 = vst [vmem:[#allocation7 + $0x20] sm:$0xff] %v95_v16  ;;  %p196_p6 = pnand %p195_p5, %p189_p2 }
  0x2f   :  { %115 = vst [vmem:[#allocation7 + $0x28] sm:$0xff] %v97_v19 }
  0x30   :  { %199 = shalt.err (!%p196_p6)
}
  0x31   :  { %s200_s10 = scalar_lea.hbm %s283_s2, 768 }
  0x32   :  { %p201_p7 = scmp.ne.s32.totalorder %s283_s2, %s200_s10  ;;  %p204_p8 = scmp.lt.u32.totalorder %s200_s10, %s283_s2 }
  0x34   :  { %p206_p9 = pnand %p204_p8, %p201_p7 }
  0x36   :  { %209 = shalt.err (!%p206_p9)
}
  0x37   :  { %127 = dma.vmem_to_hbm [thread:$0]  %s122_s6, 768, %s283_s2, [#allocation4], %s217_s19, %s217_s19, %s218_s20  }
  0x38   :  { %214 = dma.done.wait [#allocation4], 768  }
  0x39   :  { %215 = vsyncadd [#allocation4], 4294966528 }
  0x3a   :  { %131 = vsyncpa [#allocation3], 1 }
  0x3b   :  { %132 = vsyncpa [#allocation6], 1 }
  0x3c   :  { %133 = vsyncpa [#allocation4], 1 }

</bundles_post_ra>
